<compile_context>
chip_gen: v5e
topology: v5e:2x2
jax: 0.10.0
libtpu: 0.0.40
codegen_flags: <defaults>
</compile_context>

<pallas_src>
import functools

import jax
import jax.numpy as jnp
from jax.experimental import pallas as pl
from jax.experimental.pallas import tpu as pltpu


def _channel_attention_kernel(x_ref, w1t_ref, w2t_ref, o_ref,
                              sum_ref, max_ref, *, hw_total, tile_hw):
    # x_ref  : (TILE_N, C, TILE_HW)  input tile (native dtype, upcast per tile)
    # w1t_ref: (C, M)   f32  (transpose of Conv2d(C->M, 1) weight)  -- resident
    # w2t_ref: (M, C)   f32  (transpose of Conv2d(M->C, 1) weight)  -- resident
    # o_ref  : (TILE_N, C)   attention weights (written only on last HW step)
    # sum_ref/max_ref: (TILE_N, C) f32 scratch accumulators
    hw_idx = pl.program_id(1)
    num_hw = pl.num_programs(1)

    @pl.when(hw_idx == 0)
    def _init():
        sum_ref[...] = jnp.zeros_like(sum_ref)
        max_ref[...] = jnp.full_like(max_ref, -jnp.inf)

    x = x_ref[...].astype(jnp.float32)  # (TN, C, THW), f32 accumulation

    if hw_total % tile_hw != 0:
        # Mask the spatial tail of the (padded) last tile: 0 for the sum path,
        # -inf for the max path.  1-lane-row iota, broadcast by the where.
        pos = hw_idx * tile_hw + jax.lax.broadcasted_iota(
            jnp.int32, (1, 1, tile_hw), dimension=2)
        valid = pos < hw_total
        x_sum = jnp.where(valid, x, 0.0)
        x_max = jnp.where(valid, x, -jnp.inf)
    else:
        x_sum = x
        x_max = x

    sum_ref[...] = sum_ref[...] + jnp.sum(x_sum, axis=-1)
    max_ref[...] = jnp.maximum(max_ref[...], jnp.max(x_max, axis=-1))

    @pl.when(hw_idx == num_hw - 1)
    def _epilogue():
        avg_p = sum_ref[...] * (1.0 / hw_total)          # (TN, C)
        max_p = max_ref[...]                             # (TN, C)
        # Fused bottleneck: one pair of matmuls serves both pooled vectors.
        p = jnp.concatenate([avg_p, max_p], axis=0)      # (2*TN, C)
        h = jnp.dot(p, w1t_ref[...], preferred_element_type=jnp.float32)
        h = jnp.maximum(h, 0.0)                          # ReLU
        y = jnp.dot(h, w2t_ref[...], preferred_element_type=jnp.float32)
        tn = avg_p.shape[0]
        pool_sum = y[:tn, :] + y[tn:, :]                 # (TN, C)
        o_ref[...] = (1.0 / (1.0 + jnp.exp(-pool_sum))).astype(o_ref.dtype)


def _pick_tile_n(n):
    # Output block's second-to-last dim must be a multiple of 8 or equal N.
    return n if n <= 8 else 8


def _pick_tile_hw(hw, c, tile_n, itemsize, budget_bytes=8 * 1024 * 1024):
    # Largest lane-tile (multiple of 128) whose double-buffered input block
    # stays well inside scoped VMEM on every generation (incl. v7x's 64 MiB).
    if hw <= 128:
        return hw
    max_hw = budget_bytes // max(1, tile_n * c * itemsize)
    t = min(hw, max_hw, 2048)
    t = max(128, (t // 128) * 128)
    return hw if t >= hw else t


def channel_attention(x_nchw, w1, w2, *, tile_n=None, tile_hw=None):
    """x_nchw: (N, C, H, W); w1: (M, C) conv1 weight; w2: (C, M) conv2 weight.

    Returns the sigmoid channel-attention map of shape (N, C, 1, 1), matching
    the PyTorch ChannelAttention.forward output (same dtype as the input).
    """
    N, C, H, W = x_nchw.shape
    M = w1.shape[0]
    HW = H * W

    # Free reshape only — input keeps its native dtype (bf16 stays bf16),
    # halving HBM read traffic vs. a wrapper-side f32 cast.
    x3 = x_nchw.reshape(N, C, HW)
    w1t = jnp.transpose(w1).astype(jnp.float32)   # (C, M)
    w2t = jnp.transpose(w2).astype(jnp.float32)   # (M, C)

    if tile_n is None:
        tile_n = _pick_tile_n(N)
    if tile_hw is None:
        tile_hw = _pick_tile_hw(HW, C, tile_n, x3.dtype.itemsize)
    if tile_hw != HW and tile_hw % 128 != 0:
        raise ValueError("tile_hw must equal H*W or be a multiple of 128")

    grid = (pl.cdiv(N, tile_n), pl.cdiv(HW, tile_hw))

    kernel = functools.partial(
        _channel_attention_kernel, hw_total=HW, tile_hw=tile_hw)

    cost = pl.CostEstimate(
        flops=2 * N * C * HW + 8 * N * C * M,
        transcendentals=N * C,
        bytes_accessed=(x3.size * x3.dtype.itemsize
                        + (w1t.size + w2t.size) * 4
                        + N * C * x3.dtype.itemsize),
    )

    out = pl.pallas_call(
        kernel,
        out_shape=jax.ShapeDtypeStruct((N, C), x_nchw.dtype),
        grid_spec=pltpu.PrefetchScalarGridSpec(
            num_scalar_prefetch=0,
            grid=grid,
            in_specs=[
                pl.BlockSpec((tile_n, C, tile_hw), lambda n, h: (n, 0, h)),
                pl.BlockSpec((C, M), lambda n, h: (0, 0)),  # resident weights
                pl.BlockSpec((M, C), lambda n, h: (0, 0)),  # resident weights
            ],
            out_specs=pl.BlockSpec((tile_n, C), lambda n, h: (n, 0)),
            scratch_shapes=[
                pltpu.VMEM((tile_n, C), jnp.float32),   # running sum
                pltpu.VMEM((tile_n, C), jnp.float32),   # running max
            ],
        ),
        compiler_params=pltpu.CompilerParams(
            dimension_semantics=("parallel", "arbitrary"),
            vmem_limit_bytes=32 * 1024 * 1024,
        ),
        cost_estimate=cost,
    )(x3, w1t, w2t)

    return out.reshape(N, C, 1, 1)


def channel_attention_ref(x_nchw, w1, w2):
    """Pure-JAX reference mirroring the PyTorch forward (f32 math)."""
    x = x_nchw.astype(jnp.float32)
    avg_pool = jnp.mean(x, axis=(2, 3))            # (N, C)
    max_pool = jnp.max(x, axis=(2, 3))             # (N, C)

    def bottleneck(p):
        h = jax.nn.relu(p @ w1.T.astype(jnp.float32))
        return h @ w2.T.astype(jnp.float32)

    pool_sum = bottleneck(avg_pool) + bottleneck(max_pool)
    return jax.nn.sigmoid(pool_sum)[:, :, None, None]


if __name__ == "__main__":
    # Small shapes consistent with the module: N=2, C=4, H=W=16, reduction=2.
    N, C, H, W = 2, 4, 16, 16
    reduction_ratio = 2
    M = C // reduction_ratio

    key = jax.random.PRNGKey(0)
    kx, k1, k2, kx2 = jax.random.split(key, 4)

    x = jax.random.normal(kx, (N, C, H, W), dtype=jnp.float32)
    # Conv2d(C, M, 1, bias=False) weight -> (M, C); Conv2d(M, C, 1) -> (C, M).
    w1 = jax.random.normal(k1, (M, C), dtype=jnp.float32) * 0.5
    w2 = jax.random.normal(k2, (C, M), dtype=jnp.float32) * 0.5

    # 1) f32, multiple HW tiles (exercises the accumulator / epilogue path).
    out = jax.block_until_ready(channel_attention(x, w1, w2, tile_hw=128))
    ref = channel_attention_ref(x, w1, w2)
    assert out.shape == (N, C, 1, 1), out.shape
    assert jnp.allclose(out, ref, atol=1e-5, rtol=1e-5), (
        f"max abs err = {jnp.max(jnp.abs(out - ref))}")

    # 2) f32, H*W not divisible by the tile (exercises the spatial mask path).
    Hm, Wm = 15, 15
    xm = jax.random.normal(kx2, (N, C, Hm, Wm), dtype=jnp.float32)
    outm = jax.block_until_ready(channel_attention(xm, w1, w2, tile_hw=128))
    refm = channel_attention_ref(xm, w1, w2)
    assert jnp.allclose(outm, refm, atol=1e-5, rtol=1e-5), (
        f"masked-tail max abs err = {jnp.max(jnp.abs(outm - refm))}")

    # 3) bf16 input consumed directly (half the HBM read traffic), f32 accum.
    xb = x.astype(jnp.bfloat16)
    outb = jax.block_until_ready(channel_attention(xb, w1, w2, tile_hw=128))
    refb = channel_attention_ref(xb, w1, w2)
    assert outb.dtype == jnp.bfloat16
    assert jnp.allclose(outb.astype(jnp.float32), refb, atol=1e-2), (
        f"bf16 max abs err = {jnp.max(jnp.abs(outb.astype(jnp.float32) - refb))}")

    print("KERNEL_OK")
</pallas_src>

<mosaic_0001>
module attributes {stable_mosaic.version = 11 : i64} {
  func.func @_channel_attention_kernel(%arg0: i32, %arg1: i32, %arg2: memref<2x4x128xf32, #tpu.memory_space<vmem>>, %arg3: memref<4x2xf32, #tpu.memory_space<vmem>>, %arg4: memref<2x4xf32, #tpu.memory_space<vmem>>, %arg5: memref<2x4xf32, #tpu.memory_space<vmem>>, %arg6: memref<2x4xf32, #tpu.memory_space<vmem>>, %arg7: memref<2x4xf32, #tpu.memory_space<vmem>>) attributes {dimension_semantics = [#tpu.dimension_semantics<parallel>, #tpu.dimension_semantics<arbitrary>], iteration_bounds = array<i64: 1, 2>, scalar_prefetch = 0 : i64, scratch_operands = 2 : i64, tpu.core_type = #tpu.core_type<tc>, window_params = [{transform_indices = @transform_0, window_bounds = array<i64: 2, 4, 128>}, {pipeline_mode = #tpu.pipeline_mode<synchronous>, transform_indices = @transform_1, window_bounds = array<i64: 4, 2>}, {pipeline_mode = #tpu.pipeline_mode<synchronous>, transform_indices = @transform_2, window_bounds = array<i64: 2, 4>}, {transform_indices = @transform_3, window_bounds = array<i64: 2, 4>}]} {
    %c0_i32 = arith.constant 0 : i32
    %0 = arith.cmpi eq, %arg1, %c0_i32 : i32
    %1 = arith.extui %0 : i1 to i32
    %c0_i32_0 = arith.constant 0 : i32
    %2 = arith.cmpi ne, %1, %c0_i32_0 : i32
    scf.if %2 {
      %cst_13 = arith.constant 0.000000e+00 : f32
      %15 = vector.broadcast %cst_13 : f32 to vector<2x4xf32>
      %c0_14 = arith.constant 0 : index
      %c0_15 = arith.constant 0 : index
      %16 = vector.load %arg6[%c0_14, %c0_15] : memref<2x4xf32, #tpu.memory_space<vmem>>, vector<2x4xf32>
      tpu.vector_store %arg6[%c0_14, %c0_15], %15 {strides = array<i32>} : memref<2x4xf32, #tpu.memory_space<vmem>>, vector<2x4xf32>,
      %cst_16 = arith.constant 0xFF800000 : f32
      %17 = vector.broadcast %cst_16 : f32 to vector<2x4xf32>
      %c0_17 = arith.constant 0 : index
      %c0_18 = arith.constant 0 : index
      %18 = vector.load %arg7[%c0_17, %c0_18] : memref<2x4xf32, #tpu.memory_space<vmem>>, vector<2x4xf32>
      tpu.vector_store %arg7[%c0_17, %c0_18], %17 {strides = array<i32>} : memref<2x4xf32, #tpu.memory_space<vmem>>, vector<2x4xf32>,
    } else {
    }
    %c0 = arith.constant 0 : index
    %c0_1 = arith.constant 0 : index
    %c0_2 = arith.constant 0 : index
    %3 = vector.load %arg2[%c0, %c0_1, %c0_2] : memref<2x4x128xf32, #tpu.memory_space<vmem>>, vector<2x4x128xf32>
    %c0_3 = arith.constant 0 : index
    %c0_4 = arith.constant 0 : index
    %4 = vector.load %arg6[%c0_3, %c0_4] : memref<2x4xf32, #tpu.memory_space<vmem>>, vector<2x4xf32>
    %cst = arith.constant dense<0.000000e+00> : vector<2x4xf32>
    %5 = vector.multi_reduction <add>, %3, %cst [2] : vector<2x4x128xf32> to vector<2x4xf32>
    %6 = arith.addf %4, %5 : vector<2x4xf32>
    %c0_5 = arith.constant 0 : index
    %c0_6 = arith.constant 0 : index
    %7 = vector.load %arg6[%c0_5, %c0_6] : memref<2x4xf32, #tpu.memory_space<vmem>>, vector<2x4xf32>
    tpu.vector_store %arg6[%c0_5, %c0_6], %6 {strides = array<i32>} : memref<2x4xf32, #tpu.memory_space<vmem>>, vector<2x4xf32>,
    %c0_7 = arith.constant 0 : index
    %c0_8 = arith.constant 0 : index
    %8 = vector.load %arg7[%c0_7, %c0_8] : memref<2x4xf32, #tpu.memory_space<vmem>>, vector<2x4xf32>
    %cst_9 = arith.constant dense<0xFF800000> : vector<2x4xf32>
    %9 = vector.multi_reduction <maximumf>, %3, %cst_9 [2] : vector<2x4x128xf32> to vector<2x4xf32>
    %10 = arith.maximumf %8, %9 : vector<2x4xf32>
    %c0_10 = arith.constant 0 : index
    %c0_11 = arith.constant 0 : index
    %11 = vector.load %arg7[%c0_10, %c0_11] : memref<2x4xf32, #tpu.memory_space<vmem>>, vector<2x4xf32>
    tpu.vector_store %arg7[%c0_10, %c0_11], %10 {strides = array<i32>} : memref<2x4xf32, #tpu.memory_space<vmem>>, vector<2x4xf32>,
    %c1_i32 = arith.constant 1 : i32
    %12 = arith.cmpi eq, %arg1, %c1_i32 : i32
    %13 = arith.extui %12 : i1 to i32
    %c0_i32_12 = arith.constant 0 : i32
    %14 = arith.cmpi ne, %13, %c0_i32_12 : i32
    scf.if %14 {
      %c0_13 = arith.constant 0 : index
      %c0_14 = arith.constant 0 : index
      %15 = vector.load %arg6[%c0_13, %c0_14] : memref<2x4xf32, #tpu.memory_space<vmem>>, vector<2x4xf32>
      %cst_15 = arith.constant 3.906250e-03 : f32
      %16 = vector.broadcast %cst_15 : f32 to vector<2x4xf32>
      %17 = arith.mulf %15, %16 : vector<2x4xf32>
      %c0_16 = arith.constant 0 : index
      %c0_17 = arith.constant 0 : index
      %18 = vector.load %arg7[%c0_16, %c0_17] : memref<2x4xf32, #tpu.memory_space<vmem>>, vector<2x4xf32>
      %19 = tpu.concatenate %17, %18 in 0 : vector<2x4xf32>, vector<2x4xf32> -> vector<4x4xf32>
      %c0_18 = arith.constant 0 : index
      %c0_19 = arith.constant 0 : index
      %20 = vector.load %arg3[%c0_18, %c0_19] : memref<4x2xf32, #tpu.memory_space<vmem>>, vector<4x2xf32>
      %cst_20 = arith.constant dense<0.000000e+00> : vector<4x2xf32>
      %21 = tpu.matmul %19, %20, %cst_20 {dimension_numbers = #tpu.dot_dimension_numbers<[1], [0], [0], [1], [0, 0, 1, 1], [], []>} : vector<4x4xf32>, vector<4x2xf32>, vector<4x2xf32> -> vector<4x2xf32>
      %cst_21 = arith.constant 0.000000e+00 : f32
      %22 = vector.broadcast %cst_21 : f32 to vector<4x2xf32>
      %23 = arith.maximumf %21, %22 : vector<4x2xf32>
      %c0_22 = arith.constant 0 : index
      %c0_23 = arith.constant 0 : index
      %24 = vector.load %arg4[%c0_22, %c0_23] : memref<2x4xf32, #tpu.memory_space<vmem>>, vector<2x4xf32>
      %cst_24 = arith.constant dense<0.000000e+00> : vector<4x4xf32>
      %25 = tpu.matmul %23, %24, %cst_24 {dimension_numbers = #tpu.dot_dimension_numbers<[1], [0], [0], [1], [0, 0, 1, 1], [], []>} : vector<4x2xf32>, vector<2x4xf32>, vector<4x4xf32> -> vector<4x4xf32>
      %26 = vector.extract_strided_slice %25 {offsets = [0, 0], sizes = [2, 4], strides = [1, 1]} : vector<4x4xf32> to vector<2x4xf32>
      %27 = vector.extract_strided_slice %25 {offsets = [2, 0], sizes = [2, 4], strides = [1, 1]} : vector<4x4xf32> to vector<2x4xf32>
      %28 = arith.addf %26, %27 : vector<2x4xf32>
      %cst_25 = arith.constant 0.000000e+00 : f32
      %29 = vector.broadcast %cst_25 : f32 to vector<2x4xf32>
      %30 = arith.subf %29, %28 : vector<2x4xf32>
      %31 = math.exp %30 : vector<2x4xf32>
      %cst_26 = arith.constant 1.000000e+00 : f32
      %32 = vector.broadcast %cst_26 : f32 to vector<2x4xf32>
      %33 = arith.addf %32, %31 : vector<2x4xf32>
      %cst_27 = arith.constant 1.000000e+00 : f32
      %34 = vector.broadcast %cst_27 : f32 to vector<2x4xf32>
      %35 = arith.divf %34, %33 : vector<2x4xf32>
      %c0_28 = arith.constant 0 : index
      %c0_29 = arith.constant 0 : index
      %36 = vector.load %arg5[%c0_28, %c0_29] : memref<2x4xf32, #tpu.memory_space<vmem>>, vector<2x4xf32>
      tpu.vector_store %arg5[%c0_28, %c0_29], %35 {strides = array<i32>} : memref<2x4xf32, #tpu.memory_space<vmem>>, vector<2x4xf32>,
    } else {
    }
    return
  }
  func.func @transform_0(%arg0: i32, %arg1: i32) -> (i32, i32, i32) {
    %c0_i32 = arith.constant 0 : i32
    %c0_i32_0 = arith.constant 0 : i32
    return %arg0, %c0_i32, %arg1 : i32, i32, i32
  }
  func.func @transform_1(%arg0: i32, %arg1: i32) -> (i32, i32) {
    %c0_i32 = arith.constant 0 : i32
    %c0_i32_0 = arith.constant 0 : i32
    %c0_i32_1 = arith.constant 0 : i32
    return %c0_i32, %c0_i32_0 : i32, i32
  }
  func.func @transform_2(%arg0: i32, %arg1: i32) -> (i32, i32) {
    %c0_i32 = arith.constant 0 : i32
    %c0_i32_0 = arith.constant 0 : i32
    %c0_i32_1 = arith.constant 0 : i32
    return %c0_i32, %c0_i32_0 : i32, i32
  }
  func.func @transform_3(%arg0: i32, %arg1: i32) -> (i32, i32) {
    %c0_i32 = arith.constant 0 : i32
    %c0_i32_0 = arith.constant 0 : i32
    return %arg0, %c0_i32 : i32, i32
  }
}

</mosaic_0001>

<bundles_post_ra>
// kernel: tpu_custom_call.1
= control target key start
LH: loop header
LB: loop body
LE: loop exit
PB: predicated region body
PF: predicated region fallthrough
CT: control target
= control target key end

     0   :  { %8 = vsyncpa [#allocation5], 0  ;;  %s746_s0 = inlined_call_operand.hbm [shape: f32[2,4,256], index: 0, kind: input, shape index: {}]   ;;  %s747_s1 = inlined_call_operand.vmem [shape: f32[4,2], index: 1, kind: input, shape index: {}]   ;;  %s748_s2 = inlined_call_operand.vmem [shape: f32[2,4], index: 2, kind: input, shape index: {}]   ;;  %s749_s3 = inlined_call_operand.hbm [shape: f32[2,4], index: 3, kind: output, shape index: {}]  }
   0x1   :  { %10 = vsyncpa [#allocation5 + $0x1], 0 }
   0x2   :  { %11 = vsyncpa [#allocation6], 0  ;;  %s640_s12 = smov 0   ;;  %s642_s13 = smov 0  }
   0x3   :  { %s644_s14 = smov 0   ;;  %s646_s15 = smov 0  }
   0x4   :  { %s648_s16 = smov 0   ;;  %s650_s17 = smov 0  }
   0x5 LB: > { %s412_s18 = sadd.s32 4294967295, %s612_s17   ;;  %s26_s19 = sadd.s32 1, %s608_s16  ;;  %s612_s17 = sphi %s650_s17, %s17_s17   ;;  %s608_s16 = sphi %s648_s16, %s756_s16   ;;  %s604_s15 = sphi %s646_s15, %s755_s15   ;;  %s600_s14 = sphi %s644_s14, %s754_s14   ;;  %s596_s13 = sphi %s642_s13, %s753_s13   ;;  %s592_s12 = sphi %s640_s12, %s752_s12  }
   0x6   : > { %p27_p0 = scmp.ge.s32.totalorder %s26_s19, 2  ;;  %s38_s20 = sadd.s32 1, %s600_s14 }
   0x7   : > { %p45_p1 = scmp.ne.s32.totalorder %s600_s14, %s596_s13  ;;  %p46_p2 = scmp.eq.s32.totalorder %s612_s17, 0 }
   0x8   : > { %s758_s19 = smov (%p27_p0, %s26_s19), 0  ;;  %p51_p4 = scmp.ne.s32.totalorder %s596_s13, %s592_s12 }
   0x9   : > { %p676_p3 = por %p46_p2, %p45_p1  ;;  %s34_s22 = ssub.s32 %s608_s16, %s758_s19 }
   0xa   : > { %p52_p5 = scmp.eq.s32.totalorder %s412_s18, 0  ;;  %p36_p6 = scmp.eq.s32.totalorder %s34_s22, 0 }
   0xb   : > { %p439_p8 = scmp.lt.s32.totalorder %s612_s17, 2  ;;  %s149_s25 = sand.u32 1, %s600_s14  }
   0xc   : > { %p685_p7 = por %p52_p5, %p51_p4  ;;  %s416_s26 = sshll.u32 %s608_s16, 2 }
   0xd   : > { %s691_s24 = scalar_select %p36_p6, %s600_s14, %s38_s20  }
   0xe   : > { %s415_s27 = sshll.u32 %s149_s25, 3  ;;  %s160_s30 = scalar_lea.hbm %s746_s0, %s416_s26 }
   0xf   : > { %s161_s4 = sshll.u32 %s160_s30, 4  ;;  %s153_s5 = scalar_lea.vmem [#allocation4], %s415_s27  ;;  %s162_s4 = int_to_ptr.hbm [resolvable:$true] %s161_s4 }
  0x10   : > { %s163_s6 = sshll.u32 %s153_s5, 4  ;;  %p436_p9 = pnand %p439_p8, %p676_p3  ;;  %s164_s6 = int_to_ptr.vmem [resolvable:$true] %s163_s6 }
  0x11   : > { %p417_p10 = scmp.ge.s32.totalorder %s612_s17, 1  ;;  %s150_s7 = scalar_lea.sflag [#allocation5], %s149_s25 }
  0x12   : > { %s614_s8 = smov 128   ;;  %s615_s9 = smov 64  }
  0x13   : > { %s616_s10 = smov 4   ;;  %p171_p11 = scmp.lt.s32.totalorder %s612_s17, 3 }
  0x14   : > { %438 = dma.hbm_to_vmem [thread:$0]  (!%p436_p9), %s162_s4, 128, %s164_s6, %s150_s7, %s614_s8, %s615_s9, %s616_s10  }
  0x15   : > { %p172_p12 = pnand %p417_p10, %p171_p11 }
  0x16   : > { %s177_s11 = sand.u32 (!%p172_p12), 1, %s596_s13  }
  0x17   : > { %175 = sbr.rel (%p172_p12) target bundleno = 477 (0x1dd), region = 32  ;;  %s418_s12 = sshll.u32 (!%p172_p12), %s177_s11, 3 }
  0x18   : > { %s178_s20 = scalar_lea.sflag (!%p172_p12), [#allocation5], %s177_s11  ;;  %s181_s22 = scalar_lea.vmem (!%p172_p12), [#allocation4], %s418_s12 }
  0x1c   : > { %583 = dma.done.wait (%p685_p7), %s178_s20, 128  }
  0x1d   : > { %585 = vsyncadd (%p685_p7), %s178_s20, 4294967168  ;;  %p419_p13 = scmp.ne.s32.totalorder %s604_s15, 0 }
  0x1f   : > { %204 = sbr.rel (%p419_p13) target bundleno = 39 (0x27), region = 40 }
  0x24   : > { %vm205_vm0 = vcmask 25600   ;;  %v617_v0 = vmov 0.0   ;;  %v618_v1 = vmov -inf  }
  0x25   : > { %206 = vst.msk [vmem:[#allocation2] sm:$0x3] %vm205_vm0, %v617_v0 }
  0x26   : > { %207 = vst.msk [vmem:[#allocation3] sm:$0x3] %vm205_vm0, %v618_v1 }
  0x27 PF: > { %v208_v2 = vld [vmem:[%s181_s22] sm:$0xf]  ;;  %vm211_vm1 = vcmask 1043456   ;;  %v209_v5 = vld [vmem:[%s181_s22 + $0x4] sm:$0xf]  ;;  %v220_v10 = vlaneseq  ;;  %vm224_vm2 = vcmask 1041409  }
  0x28   : > { %v231_v3 = vsel %vm211_vm1, %v208_v2, -inf  ;;  %v212_v4 = vsel %vm211_vm1, %v208_v2, 0.0  ;;  %v234_v6 = vsel %vm211_vm1, %v209_v5, -inf  ;;  %v215_v7 = vsel %vm211_vm1, %v209_v5, 0.0  ;;  %p420_p0 = scmp.ne.s32.totalorder %s604_s15, 1 }
  0x29   : > { %232 = vmax.xlane.f32.xlu1 %v231_v3  ;;  %213 = vadd.xlane.f32.xlu0 %v212_v4  ;;  %v221_v11 = vand.u32 127, %v220_v10  ;;  %vm228_vm3 = vcmask 25600  }
  0x2c   : > { %v210_v18 = vld [vmem:[#allocation2] sm:$0x3] }
  0x2d   : > { %v230_v16 = vld [vmem:[#allocation3] sm:$0x3] }
  0x31   : > { %235 = vmax.xlane.f32.xlu1 %v234_v6  ;;  %216 = vadd.xlane.f32.xlu0 %v215_v7 }
  0x9c   : > { %v233_v8 = vpop.xlane.xlu1 %232  ;;  %v214_v9 = vpop.xlane.xlu0 %213 }
  0x9d   : > { %v239_v14 = vperm.slane %v233_v8, %v221_v11  ;;  %v222_v15 = vperm.slane %v214_v9, %v221_v11 }
  0xa4   : > { %v236_v12 = vpop.xlane.xlu1 %235  ;;  %v217_v13 = vpop.xlane.xlu0 %216 }
  0xa5   : > { %v240_v17 = vperm.slane %v236_v12, %v221_v11  ;;  %v223_v19 = vperm.slane %v217_v13, %v221_v11 }
  0xa7   : > { %v241_v20 = vsel %vm224_vm2, %v240_v17, %v239_v14  ;;  %v225_v21 = vsel %vm224_vm2, %v223_v19, %v222_v15  ;;  %248 = sbr.rel (%p420_p0) target bundleno = 471 (0x1d7), region = 44 }
  0xa8   : > { %v243_v22 = vmax.f32 %v230_v16, %v241_v20  ;;  %v227_v23 = vadd.f32 %v225_v21, %v210_v18 }
  0xaa   : > { %244 = vst.msk [vmem:[#allocation3] sm:$0x3] %vm228_vm3, %v243_v22 }
  0xab   : > { %229 = vst.msk [vmem:[#allocation2] sm:$0x3] %vm228_vm3, %v227_v23 }
  0xac   : > { %v257_v24 = vld [vmem:[%s747_s1] sm:$0xf]  ;;  %vm255_vm4 = vcmask 1041408   ;;  %vm258_vm5 = vcmask 31744   ;;  %vm287_vm6 = vcmask 15360  }
  0xad   : > { %421 = vmatpush.msk.msra.mxu0 %vm211_vm1, %v257_v24  ;;  %v286_v30 = vld [vmem:[%s748_s2] sm:$0x3] }
  0xae   : > { %423 = vmatpush.msk.msra.mxu1 %vm255_vm4, %v286_v30 }
  0xb1   : > { %v251_v26 = vld [vmem:[#allocation3] sm:$0x3] }
  0xb2   : > { %v249_v25 = vld [vmem:[#allocation2] sm:$0x3]  ;;  %v253_v28 = vrot.slane %v251_v26, 6 }
  0xb3   : > { %v250_v27 = vmul.f32 0.00390625, %v249_v25 }
  0xb5   : > { %v256_v29 = vsel %vm255_vm4, %v250_v27, %v253_v28 }
  0xb6   : > { %422 = vmatmul.msk.f32.vlgmr.msra.gmra.mxu0 %vm258_vm5, %v256_v29 }
 0x133   : > { %v282_v31 = vpop.f32.mrf.mxu0 }
 0x134   : > { %v285_v32 = vmax.f32 %v282_v31, 0.0 }
 0x136   : > { %424 = vmatmul.msk.f32.vlgmr.msra.gmra.mxu1 %vm287_vm6, %v285_v32 }
 0x1b3   : > { %v311_v33 = vpop.f32.mrf.mxu1 }
 0x1b4   : > { %v315_v34 = vrot.slane %v311_v33, 2 }
 0x1b6   : > { %v317_v35 = vadd.f32 %v315_v34, %v311_v33 }
 0x1b8   : > { %v318_v36 = vsub.f32 0.0, %v317_v35 }
 0x1ba   : > { %v319_v37 = vmul.f32 1.442695, %v318_v36 }
 0x1bc   : > { %496 = vpow2.f32 %v319_v37 }
 0x1c2   : > { %v497_v38 = vpop.eup %496 }
 0x1c3   : > { %v321_v39 = vadd.f32 1.0, %v497_v38 }
 0x1c5   : > { %498 = vrcp.f32 %v321_v39  ;;  %v333_v43 = vand.u32 2147483648, %v321_v39  ;;  %v331_v45 = vand.u32 2147483647, %v321_v39  ;;  %vm327_vm8 = vweird.f32 %v321_v39 }
 0x1c7   : > { %v334_v47 = vor.u32 1.1754944e-38, %v333_v43  ;;  %vm332_vm10 = vcmp.eq.f32.partialorder %v331_v45, 8.507059e+37 }
 0x1cb   : > { %v499_v40 = vpop.eup %498 }
 0x1cc   : > { %v323_v41 = vmul.f32 %v499_v40, %v321_v39  ;;  %vm328_vm7 = vweird.f32 %v499_v40 }
 0x1cd   : > { %vm329_vm9 = vmor %vm327_vm8, %vm328_vm7 }
 0x1ce   : > { %v324_v42 = vsub.f32 1.0, %v323_v41 }
 0x1d0   : > { %v325_v44 = vmul.f32 %v499_v40, %v324_v42 }
 0x1d2   : > { %v326_v46 = vadd.f32 %v499_v40, %v325_v44 }
 0x1d4   : > { %v330_v48 = vsel %vm329_vm9, %v499_v40, %v326_v46 }
 0x1d5   : > { %v335_v49 = vsel %vm332_vm10, %v334_v47, %v330_v48 }
 0x1d6   : > { %337 = vst.msk [vmem:[#allocation7] sm:$0x3] %vm228_vm3, %v335_v49 }
 0x1d7 PF: > { %p440_p1 = scmp.eq.s32.totalorder %s412_s18, 1  ;;  %s348_s28 = sshll.u32 %s749_s3, 4  ;;  %s349_s28 = int_to_ptr.hbm [resolvable:$true] %s348_s28 }
 0x1d8   : > { %s619_s29 = smov [#allocation7]  }
 0x1d9   : > { %s346_s30 = sshll.u32 %s619_s29, 4  ;;  %s347_s30 = int_to_ptr.vmem [resolvable:$true] %s346_s30 }
 0x1da   : > { %432 = dma.vmem_to_hbm [thread:$0]  (%p440_p1), %s347_s30, 32, %s349_s28, [#allocation6]  }
 0x1db   : > { %587 = dma.done.wait (%p440_p1), [#allocation6], 32  }
 0x1dc   : > { %589 = vsyncadd (%p440_p1), [#allocation6], 4294967264 }
 0x1dd PF: > { %s17_s17 = sadd.s32 1, %s612_s17   ;;  %s752_s12 = smov %s596_s13 }
 0x1de   : > { %p14_p2 = scmp.ge.s32.totalorder %s17_s17, 4   ;;  %s753_s13 = smov %s600_s14 }
 0x1df   : > { %s754_s14 = smov %s691_s24  ;;  %s755_s15 = smov %s608_s16 }
 0x1e0   : > { %s756_s16 = smov %s758_s19  ;;  %16 = sbr.rel (!%p14_p2) target bundleno = 5 (0x5), region = 78 }
 0x1e5   :  { %362 = vsyncpa [#allocation5], 1 }
 0x1e6   :  { %364 = vsyncpa [#allocation5 + $0x1], 1 }
 0x1e7   :  { %365 = vsyncpa [#allocation6], 1 }
 0x1e8   :  { %367 = vsyncpa [#allocation6 + $0x1], 1 }

</bundles_post_ra>
